<compile_context>
chip_gen: v7x
topology: tpu7x:2x2x1
jax: 0.10.0
libtpu: 0.0.40
codegen_flags: <defaults>
</compile_context>

<pallas_src>
import functools

import jax
import jax.numpy as jnp
from jax import lax
from jax.experimental import pallas as pl
from jax.experimental.pallas import tpu as pltpu

CLAMP_LO = 1e-4
CLAMP_HI = 1.0 - 1e-4
LANES = 128
MAX_TILE_ROWS = 2048          # (2048, 128) f32 block = 1 MiB per input


def _ffl_kernel(out_ref, tgt_ref, pos_ref, msk_ref,        # inputs
                neg_out, pos_out, npos_out,                # (1,1) SMEM blocks
                acc_ref,                                    # VMEM scratch
                *, n_valid, tile_rows, per_split, ragged):
    i = pl.program_id(1)                                    # block within split

    @pl.when(i == 0)
    def _init():
        acc_ref[...] = jnp.zeros_like(acc_ref)

    # ---- dense negative loss: log(1-p) * p^2 * (1-gt)^4 --------------------
    pred = jnp.clip(out_ref[...].astype(jnp.float32), CLAMP_LO, CLAMP_HI)
    gt = tgt_ref[...].astype(jnp.float32)
    g = 1.0 - gt
    g2 = g * g
    neg = jnp.log(1.0 - pred) * (pred * pred) * (g2 * g2)

    if ragged:  # static Python flag: mask flat positions >= n_valid (tail/pad)
        c = pl.program_id(0)
        blk = c * per_split + i
        r = lax.broadcasted_iota(jnp.int32, neg.shape, 0)
        l = lax.broadcasted_iota(jnp.int32, neg.shape, 1)
        flat = (blk * tile_rows + r) * LANES + l
        neg = jnp.where(flat < n_valid, neg, 0.0)           # select, NaN-safe

    acc_ref[...] += neg

    # ---- finalize once per split --------------------------------------------
    @pl.when(i == per_split - 1)
    def _fin():
        neg_out[0, 0] = jnp.sum(acc_ref[...])
        # positive loss on the pre-gathered (B, M) peak predictions
        p = jnp.clip(pos_ref[...].astype(jnp.float32), CLAMP_LO, CLAMP_HI)
        m = msk_ref[...].astype(jnp.float32)
        omp = 1.0 - p
        pos_out[0, 0] = jnp.sum(jnp.log(p) * omp * omp * m)
        npos_out[0, 0] = jnp.sum(m)


def fast_focal_loss(outx, target, ind, mask, cat):
    """outx, target: (B, C, H, W); ind, mask, cat: (B, M). Returns scalar loss."""
    B, C, H, W = outx.shape
    _, M = ind.shape
    HW = H * W
    n = B * C * HW

    # lane-dense flat views (plain reshape; no full-tensor pad copy)
    out_flat = outx.reshape(-1)
    tgt_flat = target.reshape(-1)
    pad = (-n) % LANES
    if pad:  # rare: only when B*C*H*W is not a multiple of 128
        out_flat = jnp.pad(out_flat, (0, pad))
        tgt_flat = jnp.pad(tgt_flat, (0, pad))
    rows = (n + pad) // LANES
    out2d = out_flat.reshape(rows, LANES)
    tgt2d = tgt_flat.reshape(rows, LANES)

    tile_rows = rows if rows <= MAX_TILE_ROWS else MAX_TILE_ROWS
    nblk = pl.cdiv(rows, tile_rows)
    split = 2 if (nblk >= 2 and nblk % 2 == 0) else 1       # 2-TC split (v7x)
    per_split = nblk // split
    ragged = (split * per_split * tile_rows * LANES) != n

    # TODO(synk): the B*M-element peak gather stays in XLA (it only touches
    # B*M elements); an in-kernel DMA gather is not worth it per the review.
    #   feat[b, ind, cat] (NHWC view) == out_flat[b, cat*H*W + ind] (NCHW)
    ind32 = ind.astype(jnp.int32)
    cat32 = cat.astype(jnp.int32)
    mask_f = mask.astype(jnp.float32)
    gidx = jnp.clip(cat32 * HW + ind32, 0, C * HW - 1)      # safe for masked slots
    pos_pred = jnp.take_along_axis(outx.reshape(B, C * HW), gidx, axis=1)

    kernel = functools.partial(_ffl_kernel, n_valid=n, tile_rows=tile_rows,
                               per_split=per_split, ragged=ragged)

    def dense_map(c, i):
        return (c * per_split + i, 0)

    smem = pltpu.MemorySpace.SMEM
    scalar_spec = pl.BlockSpec((1, 1), lambda c, i: (c, 0), memory_space=smem)
    scalar_shape = jax.ShapeDtypeStruct((split, 1), jnp.float32)

    itemsize = jnp.dtype(outx.dtype).itemsize
    cost = pl.CostEstimate(flops=10 * n, transcendentals=n,
                           bytes_accessed=2 * n * itemsize)

    neg_p, pos_p, npos_p = pl.pallas_call(
        kernel,
        grid=(split, per_split),
        in_specs=[
            pl.BlockSpec((tile_rows, LANES), dense_map),     # out tiles
            pl.BlockSpec((tile_rows, LANES), dense_map),     # target tiles
            pl.BlockSpec((B, M), lambda c, i: (0, 0)),       # gathered peaks
            pl.BlockSpec((B, M), lambda c, i: (0, 0)),       # mask
        ],
        out_specs=[scalar_spec, scalar_spec, scalar_spec],
        out_shape=[scalar_shape, scalar_shape, scalar_shape],
        scratch_shapes=[pltpu.VMEM((tile_rows, LANES), jnp.float32)],
        compiler_params=pltpu.CompilerParams(
            dimension_semantics=("parallel", "arbitrary")),
        cost_estimate=cost,
    )(out2d, tgt2d, pos_pred, mask_f)

    neg_loss = jnp.sum(neg_p)            # per-split partial sums
    pos_loss = pos_p[0, 0]               # identical across splits
    num_pos = npos_p[0, 0]
    safe = jnp.where(num_pos == 0, jnp.float32(1.0), num_pos)
    return jnp.where(num_pos == 0, -neg_loss, -(pos_loss + neg_loss) / safe)


def _reference_loss(outx, target, ind, mask, cat):
    """Pure-JAX replica of the PyTorch forward, used as a correctness check."""
    out = jnp.clip(outx, CLAMP_LO, CLAMP_HI)
    neg = jnp.sum(jnp.log(1.0 - out) * out ** 2 * (1.0 - target) ** 4)
    B, C, H, W = outx.shape
    feat = jnp.transpose(out, (0, 2, 3, 1)).reshape(B, H * W, C)
    pos_pix = jnp.take_along_axis(feat, ind[:, :, None].astype(jnp.int32), axis=1)
    pos_pred = jnp.take_along_axis(
        pos_pix, cat[:, :, None].astype(jnp.int32), axis=2)[..., 0]
    num_pos = jnp.sum(mask.astype(jnp.float32))
    pos = jnp.sum(jnp.log(pos_pred) * (1.0 - pos_pred) ** 2
                  * mask.astype(jnp.float32))
    safe = jnp.where(num_pos == 0, 1.0, num_pos)
    return jnp.where(num_pos == 0, -neg, -(pos + neg) / safe)


if __name__ == "__main__":
    key = jax.random.PRNGKey(0)
    cases = [
        (2, 4, 16, 16, 8),       # canonical small case (single clean block)
        (1, 3, 5, 7, 4),         # flat size not a multiple of 128 -> masked tail
        (2, 16, 128, 128, 32),   # multi-block, 2-way "parallel" split, clean
        (1, 18, 128, 128, 16),   # 2-way split + ragged (masked) last block
    ]
    for (B, C, H, W, M) in cases:
        key, k1, k2, k3, k4, k5 = jax.random.split(key, 6)
        outx = jax.random.uniform(k1, (B, C, H, W), jnp.float32, 0.01, 0.99)
        target = jax.random.uniform(k2, (B, C, H, W), jnp.float32, 0.0, 1.0)
        ind = jax.random.randint(k3, (B, M), 0, H * W, jnp.int32)
        cat = jax.random.randint(k4, (B, M), 0, C, jnp.int32)
        mask = (jax.random.uniform(k5, (B, M)) > 0.3).astype(jnp.float32)

        loss = jax.block_until_ready(fast_focal_loss(outx, target, ind, mask, cat))
        ref = jax.block_until_ready(_reference_loss(outx, target, ind, mask, cat))
        assert jnp.allclose(loss, ref, rtol=2e-3, atol=1e-3), (B, C, H, W, M, loss, ref)

    print("KERNEL_OK")
</pallas_src>

<mosaic_0001>
module attributes {stable_mosaic.version = 11 : i64} {
  func.func @_ffl_kernel(%arg0: i32, %arg1: i32, %arg2: memref<16x128xf32, #tpu.memory_space<vmem>>, %arg3: memref<16x128xf32, #tpu.memory_space<vmem>>, %arg4: memref<2x8xf32, #tpu.memory_space<vmem>>, %arg5: memref<2x8xf32, #tpu.memory_space<vmem>>, %arg6: memref<1x1xf32, #tpu.memory_space<smem>>, %arg7: memref<1x1xf32, #tpu.memory_space<smem>>, %arg8: memref<1x1xf32, #tpu.memory_space<smem>>, %arg9: memref<16x128xf32, #tpu.memory_space<vmem>>) attributes {dimension_semantics = [#tpu.dimension_semantics<parallel>, #tpu.dimension_semantics<arbitrary>], iteration_bounds = array<i64: 1, 1>, scalar_prefetch = 0 : i64, scratch_operands = 1 : i64, tpu.core_type = #tpu.core_type<tc>, window_params = [{transform_indices = @transform_0, window_bounds = array<i64: 16, 128>}, {transform_indices = @transform_1, window_bounds = array<i64: 16, 128>}, {pipeline_mode = #tpu.pipeline_mode<synchronous>, transform_indices = @transform_2, window_bounds = array<i64: 2, 8>}, {pipeline_mode = #tpu.pipeline_mode<synchronous>, transform_indices = @transform_3, window_bounds = array<i64: 2, 8>}, {transform_indices = @transform_4, window_bounds = array<i64: 1, 1>}, {transform_indices = @transform_5, window_bounds = array<i64: 1, 1>}, {transform_indices = @transform_6, window_bounds = array<i64: 1, 1>}]} {
    %c0_i32 = arith.constant 0 : i32
    %0 = arith.cmpi eq, %arg1, %c0_i32 : i32
    %1 = arith.extui %0 : i1 to i32
    %c0_i32_0 = arith.constant 0 : i32
    %2 = arith.cmpi ne, %1, %c0_i32_0 : i32
    scf.if %2 {
      %cst_13 = arith.constant 0.000000e+00 : f32
      %25 = vector.broadcast %cst_13 : f32 to vector<16x128xf32>
      %c0_14 = arith.constant 0 : index
      %c0_15 = arith.constant 0 : index
      %26 = vector.load %arg9[%c0_14, %c0_15] : memref<16x128xf32, #tpu.memory_space<vmem>>, vector<16x128xf32>
      tpu.vector_store %arg9[%c0_14, %c0_15], %25 {strides = array<i32>} : memref<16x128xf32, #tpu.memory_space<vmem>>, vector<16x128xf32>,
    } else {
    }
    %c0 = arith.constant 0 : index
    %c0_1 = arith.constant 0 : index
    %3 = vector.load %arg2[%c0, %c0_1] : memref<16x128xf32, #tpu.memory_space<vmem>>, vector<16x128xf32>
    %cst = arith.constant 9.99999974E-5 : f32
    %cst_2 = arith.constant 0.999899983 : f32
    %4 = vector.broadcast %cst : f32 to vector<16x128xf32>
    %5 = arith.maximumf %4, %3 : vector<16x128xf32>
    %6 = vector.broadcast %cst_2 : f32 to vector<16x128xf32>
    %7 = arith.minimumf %6, %5 : vector<16x128xf32>
    %c0_3 = arith.constant 0 : index
    %c0_4 = arith.constant 0 : index
    %8 = vector.load %arg3[%c0_3, %c0_4] : memref<16x128xf32, #tpu.memory_space<vmem>>, vector<16x128xf32>
    %cst_5 = arith.constant 1.000000e+00 : f32
    %9 = vector.broadcast %cst_5 : f32 to vector<16x128xf32>
    %10 = arith.subf %9, %8 : vector<16x128xf32>
    %11 = arith.mulf %10, %10 : vector<16x128xf32>
    %cst_6 = arith.constant 1.000000e+00 : f32
    %12 = vector.broadcast %cst_6 : f32 to vector<16x128xf32>
    %13 = arith.subf %12, %7 : vector<16x128xf32>
    %14 = math.log %13 : vector<16x128xf32>
    %15 = arith.mulf %7, %7 : vector<16x128xf32>
    %16 = arith.mulf %14, %15 : vector<16x128xf32>
    %17 = arith.mulf %11, %11 : vector<16x128xf32>
    %18 = arith.mulf %16, %17 : vector<16x128xf32>
    %c0_7 = arith.constant 0 : index
    %c0_8 = arith.constant 0 : index
    %19 = vector.load %arg9[%c0_7, %c0_8] : memref<16x128xf32, #tpu.memory_space<vmem>>, vector<16x128xf32>
    %20 = arith.addf %19, %18 : vector<16x128xf32>
    %c0_9 = arith.constant 0 : index
    %c0_10 = arith.constant 0 : index
    %21 = vector.load %arg9[%c0_9, %c0_10] : memref<16x128xf32, #tpu.memory_space<vmem>>, vector<16x128xf32>
    tpu.vector_store %arg9[%c0_9, %c0_10], %20 {strides = array<i32>} : memref<16x128xf32, #tpu.memory_space<vmem>>, vector<16x128xf32>,
    %c0_i32_11 = arith.constant 0 : i32
    %22 = arith.cmpi eq, %arg1, %c0_i32_11 : i32
    %23 = arith.extui %22 : i1 to i32
    %c0_i32_12 = arith.constant 0 : i32
    %24 = arith.cmpi ne, %23, %c0_i32_12 : i32
    scf.if %24 {
      %c0_13 = arith.constant 0 : index
      %c0_14 = arith.constant 0 : index
      %25 = vector.load %arg9[%c0_13, %c0_14] : memref<16x128xf32, #tpu.memory_space<vmem>>, vector<16x128xf32>
      %26 = vector.shape_cast %25 : vector<16x128xf32> to vector<1x16x128xf32>
      %cst_15 = arith.constant dense<0.000000e+00> : vector<1xf32>
      %27 = vector.multi_reduction <add>, %26, %cst_15 [1, 2] : vector<1x16x128xf32> to vector<1xf32>
      %28 = vector.shape_cast %27 : vector<1xf32> to vector<1x1x1xf32>
      %29 = vector.extract %28[0, 0, 0] : f32 from vector<1x1x1xf32>
      %c0_16 = arith.constant 0 : index
      %c0_17 = arith.constant 0 : index
      %30 = memref.load %arg6[%c0_16, %c0_17] : memref<1x1xf32, #tpu.memory_space<smem>>
      memref.store %29, %arg6[%c0_16, %c0_17] : memref<1x1xf32, #tpu.memory_space<smem>>
      %c0_18 = arith.constant 0 : index
      %c0_19 = arith.constant 0 : index
      %31 = vector.load %arg4[%c0_18, %c0_19] : memref<2x8xf32, #tpu.memory_space<vmem>>, vector<2x8xf32>
      %cst_20 = arith.constant 9.99999974E-5 : f32
      %cst_21 = arith.constant 0.999899983 : f32
      %32 = vector.broadcast %cst_20 : f32 to vector<2x8xf32>
      %33 = arith.maximumf %32, %31 : vector<2x8xf32>
      %34 = vector.broadcast %cst_21 : f32 to vector<2x8xf32>
      %35 = arith.minimumf %34, %33 : vector<2x8xf32>
      %c0_22 = arith.constant 0 : index
      %c0_23 = arith.constant 0 : index
      %36 = vector.load %arg5[%c0_22, %c0_23] : memref<2x8xf32, #tpu.memory_space<vmem>>, vector<2x8xf32>
      %cst_24 = arith.constant 1.000000e+00 : f32
      %37 = vector.broadcast %cst_24 : f32 to vector<2x8xf32>
      %38 = arith.subf %37, %35 : vector<2x8xf32>
      %39 = math.log %35 : vector<2x8xf32>
      %40 = arith.mulf %39, %38 : vector<2x8xf32>
      %41 = arith.mulf %40, %38 : vector<2x8xf32>
      %42 = arith.mulf %41, %36 : vector<2x8xf32>
      %43 = vector.shape_cast %42 : vector<2x8xf32> to vector<1x2x8xf32>
      %cst_25 = arith.constant dense<0.000000e+00> : vector<1xf32>
      %44 = vector.multi_reduction <add>, %43, %cst_25 [1, 2] : vector<1x2x8xf32> to vector<1xf32>
      %45 = vector.shape_cast %44 : vector<1xf32> to vector<1x1x1xf32>
      %46 = vector.extract %45[0, 0, 0] : f32 from vector<1x1x1xf32>
      %c0_26 = arith.constant 0 : index
      %c0_27 = arith.constant 0 : index
      %47 = memref.load %arg7[%c0_26, %c0_27] : memref<1x1xf32, #tpu.memory_space<smem>>
      memref.store %46, %arg7[%c0_26, %c0_27] : memref<1x1xf32, #tpu.memory_space<smem>>
      %48 = vector.shape_cast %36 : vector<2x8xf32> to vector<1x2x8xf32>
      %cst_28 = arith.constant dense<0.000000e+00> : vector<1xf32>
      %49 = vector.multi_reduction <add>, %48, %cst_28 [1, 2] : vector<1x2x8xf32> to vector<1xf32>
      %50 = vector.shape_cast %49 : vector<1xf32> to vector<1x1x1xf32>
      %51 = vector.extract %50[0, 0, 0] : f32 from vector<1x1x1xf32>
      %c0_29 = arith.constant 0 : index
      %c0_30 = arith.constant 0 : index
      %52 = memref.load %arg8[%c0_29, %c0_30] : memref<1x1xf32, #tpu.memory_space<smem>>
      memref.store %51, %arg8[%c0_29, %c0_30] : memref<1x1xf32, #tpu.memory_space<smem>>
    } else {
    }
    return
  }
  func.func @transform_0(%arg0: i32, %arg1: i32) -> (i32, i32) {
    %c1_i32 = arith.constant 1 : i32
    %0 = arith.muli %arg0, %c1_i32 : i32
    %1 = arith.addi %0, %arg1 : i32
    %c0_i32 = arith.constant 0 : i32
    %c0_i32_0 = arith.constant 0 : i32
    return %1, %c0_i32 : i32, i32
  }
  func.func @transform_1(%arg0: i32, %arg1: i32) -> (i32, i32) {
    %c1_i32 = arith.constant 1 : i32
    %0 = arith.muli %arg0, %c1_i32 : i32
    %1 = arith.addi %0, %arg1 : i32
    %c0_i32 = arith.constant 0 : i32
    %c0_i32_0 = arith.constant 0 : i32
    return %1, %c0_i32 : i32, i32
  }
  func.func @transform_2(%arg0: i32, %arg1: i32) -> (i32, i32) {
    %c0_i32 = arith.constant 0 : i32
    %c0_i32_0 = arith.constant 0 : i32
    %c0_i32_1 = arith.constant 0 : i32
    return %c0_i32, %c0_i32_0 : i32, i32
  }
  func.func @transform_3(%arg0: i32, %arg1: i32) -> (i32, i32) {
    %c0_i32 = arith.constant 0 : i32
    %c0_i32_0 = arith.constant 0 : i32
    %c0_i32_1 = arith.constant 0 : i32
    return %c0_i32, %c0_i32_0 : i32, i32
  }
  func.func @transform_4(%arg0: i32, %arg1: i32) -> (i32, i32) {
    %c0_i32 = arith.constant 0 : i32
    %c0_i32_0 = arith.constant 0 : i32
    return %arg0, %c0_i32 : i32, i32
  }
  func.func @transform_5(%arg0: i32, %arg1: i32) -> (i32, i32) {
    %c0_i32 = arith.constant 0 : i32
    %c0_i32_0 = arith.constant 0 : i32
    return %arg0, %c0_i32 : i32, i32
  }
  func.func @transform_6(%arg0: i32, %arg1: i32) -> (i32, i32) {
    %c0_i32 = arith.constant 0 : i32
    %c0_i32_0 = arith.constant 0 : i32
    return %arg0, %c0_i32 : i32, i32
  }
}

</mosaic_0001>

<bundles_post_ra>
// kernel: tpu_custom_call.1
= control target key start
LH: loop header
LB: loop body
LE: loop exit
PB: predicated region body
PF: predicated region fallthrough
CT: control target
= control target key end

     0   :  { %12 = vsyncpa [#allocation4], 0  ;;  %s401_s0 = inlined_call_operand.hbm [shape: f32[16,128], index: 0, kind: input, shape index: {}]   ;;  %s402_s1 = inlined_call_operand.hbm [shape: f32[16,128], index: 1, kind: input, shape index: {}]   ;;  %s403_s2 = inlined_call_operand.vmem [shape: f32[2,8], index: 2, kind: input, shape index: {}]   ;;  %s404_s3 = inlined_call_operand.vmem [shape: f32[2,8], index: 3, kind: input, shape index: {}]   ;;  %s405_s4 = inlined_call_operand.hbm [shape: f32[1,1], index: 4, kind: output, shape index: {0}]   ;;  %s406_s5 = inlined_call_operand.hbm [shape: f32[1,1], index: 5, kind: output, shape index: {1}]   ;;  %s407_s6 = inlined_call_operand.hbm [shape: f32[1,1], index: 6, kind: output, shape index: {2}]  }
   0x1   :  { %13 = vsyncpa [#allocation7], 0 }
   0x2   :  { %14 = vsyncpa [#allocation5], 0 }
   0x3   :  { %15 = vsyncpa [#allocation10], 0  ;;  %s291_s21 = smov [#allocation3]   ;;  %s209_s25 = scalar_lea.hbm %s401_s0, 256 }
   0x4   :  { %s25_s22 = sshll.u32 %s291_s21, 4  ;;  %p210_p0 = scmp.ne.s32.totalorder %s401_s0, %s209_s25  ;;  %s26_s22 = int_to_ptr.vmem [resolvable:$true] %s25_s22 }
   0x5   :  { %p213_p1 = scmp.lt.u32.totalorder %s209_s25, %s401_s0 }
   0x7   :  { %p215_p2 = pnand %p213_p1, %p210_p0 }
   0x9   :  { %218 = shalt.err (!%p215_p2)
}
   0xa   :  { %s219_s30 = scalar_lea.vmem %s26_s22, 256  ;;  %p224_p4 = scmp.lt.s32.totalorder %s26_s22, %s26_s22 }
   0xb   :  { %p220_p3 = scmp.ne.s32.totalorder %s26_s22, %s219_s30  ;;  %p225_p5 = scmp.lt.s32.totalorder %s219_s30, %s219_s30 }
   0xd   :  { %p226_p6 = por %p225_p5, %p224_p4 }
   0xf   :  { %p227_p7 = pnand %p226_p6, %p220_p3 }
  0x11   :  { %230 = shalt.err (!%p227_p7)
}
  0x12   :  { %s292_s7 = smov 128   ;;  %s293_s8 = smov 8  }
  0x13   :  { %31 = dma.hbm_to_vmem [thread:$0]  %s401_s0, 256, %s26_s22, [#allocation4], %s292_s7, %s292_s7, %s293_s8  }
  0x14   :  { %s294_s11 = smov [#allocation6]   ;;  %s231_s15 = scalar_lea.hbm %s402_s1, 256 }
  0x15   :  { %s41_s12 = sshll.u32 %s294_s11, 4  ;;  %p232_p8 = scmp.ne.s32.totalorder %s402_s1, %s231_s15  ;;  %s42_s12 = int_to_ptr.vmem [resolvable:$true] %s41_s12 }
  0x16   :  { %p235_p9 = scmp.lt.u32.totalorder %s231_s15, %s402_s1 }
  0x18   :  { %p237_p10 = pnand %p235_p9, %p232_p8 }
  0x1a   :  { %240 = shalt.err (!%p237_p10)
}
  0x1b   :  { %s241_s20 = scalar_lea.vmem %s42_s12, 256  ;;  %p246_p12 = scmp.lt.s32.totalorder %s42_s12, %s42_s12 }
  0x1c   :  { %p242_p11 = scmp.ne.s32.totalorder %s42_s12, %s241_s20  ;;  %p247_p13 = scmp.lt.s32.totalorder %s241_s20, %s241_s20 }
  0x1e   :  { %p248_p0 = por %p247_p13, %p246_p12 }
  0x20   :  { %p249_p1 = pnand %p248_p0, %p242_p11 }
  0x22   :  { %252 = shalt.err (!%p249_p1)
}
  0x23   :  { %47 = dma.hbm_to_vmem [thread:$0]  %s402_s1, 256, %s42_s12, [#allocation7], %s292_s7, %s292_s7, %s293_s8  }
  0x24   :  { %283 = dma.done.wait [#allocation4], 256  }
  0x25   :  { %284 = vsyncadd [#allocation4], 4294967040 }
  0x26   :  { %285 = dma.done.wait [#allocation7], 256  }
  0x27   :  { %286 = vsyncadd [#allocation7], 4294967040  ;;  %vm127_vm0 = vcmask 58368   ;;  %v120_v0 = vld [vmem:[%s404_s3] sm:$0x3]  ;;  %v69_v5 = vld [vmem:[#allocation3 + $0x8] sm:$0xff] }
  0x28   :  { %v117_v1 = vld [vmem:[%s403_s2] sm:$0x3]  ;;  %v140_v3 = vsel %vm127_vm0, %v120_v0, 0.0  ;;  %v71_v7 = vmax.f32 %v69_v5, 0.0001  ;;  %v74_v13 = vld [vmem:[#allocation6] sm:$0xff] }
  0x29   :  { %v68_v2 = vld [vmem:[#allocation3] sm:$0xff]  ;;  %v118_v4 = vmax.f32 %v117_v1, 0.0001  ;;  %141 = vadd.xlane.f32.xlu1 %v140_v3  ;;  %v75_v14 = vld [vmem:[#allocation6 + $0x8] sm:$0xff]  ;;  %v76_v15 = vsub.f32 1.0, %v74_v13  ;;  %s253_s26 = scalar_lea.hbm %s405_s4, 16 }
  0x2a   :  { %v70_v6 = vmax.f32 %v68_v2, 0.0001  ;;  %v73_v10 = vmin.f32 %v71_v7, 0.9999  ;;  %v77_v16 = vsub.f32 1.0, %v75_v14  ;;  %p254_p2 = scmp.ne.s32.totalorder %s405_s4, %s253_s26  ;;  %p257_p3 = scmp.lt.u32.totalorder %s253_s26, %s405_s4 }
  0x2b   :  { %v119_v8 = vmin.f32 %v118_v4, 0.9999  ;;  %v78_v19 = vmul.f32 %v76_v15, %v76_v15 }
  0x2c   :  { %v72_v9 = vmin.f32 %v70_v6, 0.9999  ;;  %v81_v12 = vsub.f32 1.0, %v73_v10  ;;  %v79_v21 = vmul.f32 %v77_v16, %v77_v16  ;;  %v87_v25 = vmul.f32 %v73_v10, %v73_v10  ;;  %p259_p4 = pnand %p257_p3, %p254_p2 }
  0x2d   :  { %203 = vlog2.f32 %v119_v8  ;;  %v121_v17 = vsub.f32 1.0, %v119_v8  ;;  %v90_v28 = vmul.f32 %v78_v19, %v78_v19 }
  0x2e   :  { %v80_v11 = vsub.f32 1.0, %v72_v9  ;;  %v86_v22 = vmul.f32 %v72_v9, %v72_v9  ;;  %v91_v30 = vmul.f32 %v79_v21, %v79_v21 }
  0x30   :  { %205 = vlog2.f32 %v80_v11 }
  0x31   :  { %207 = vlog2.f32 %v81_v12 }
  0x37   :  { %v204_v18 = vpop.eup %203 }
  0x38   :  { %v123_v20 = vmul.f32 0.6931472, %v204_v18 }
  0x3a   :  { %v206_v23 = vpop.eup %205  ;;  %v124_v24 = vmul.f32 %v123_v20, %v121_v17 }
  0x3b   :  { %v208_v26 = vpop.eup %207  ;;  %v83_v27 = vmul.f32 0.6931472, %v206_v23 }
  0x3c   :  { %v85_v29 = vmul.f32 0.6931472, %v208_v26  ;;  %v125_v31 = vmul.f32 %v124_v24, %v121_v17 }
  0x3d   :  { %v88_v32 = vmul.f32 %v86_v22, %v83_v27 }
  0x3e   :  { %v89_v33 = vmul.f32 %v87_v25, %v85_v29  ;;  %v126_v36 = vmul.f32 %v125_v31, %v120_v0 }
  0x3f   :  { %v92_v34 = vmul.f32 %v90_v28, %v88_v32 }
  0x40   :  { %v93_v35 = vmul.f32 %v91_v30, %v89_v33  ;;  %v128_v38 = vsel %vm127_vm0, %v126_v36, 0.0 }
  0x42   :  { %v105_v37 = vadd.f32 %v93_v35, %v92_v34 }
  0x44   :  { %106 = vadd.xlane.f32.xlu0 %v105_v37 }
  0x48   :  { %129 = vadd.xlane.f32.xlu0 %v128_v38 }
  0xb6   :  { %v142_v39 = vpop.xlane.xlu1 %141 }
  0xb7   :  { %v143_v40 = vrot.slane %v142_v39, 4 }
  0xb9   :  { %v144_v41 = vadd.f32 %v143_v40, %v142_v39 }
  0xbb   :  { %v145_v45 = vrot.slane %v144_v41, 2 }
  0xbd   :  { %v146_v51 = vadd.f32 %v145_v45, %v144_v41 }
  0xbf   :  { %v147_v56 = vrot.slane %v146_v51, 1 }
  0xc1   :  { %v148_v59 = vadd.f32 %v147_v56, %v146_v51 }
  0xd1   :  { %v107_v42 = vpop.xlane.xlu0 %106 }
  0xd2   :  { %v108_v43 = vrot.slane %v107_v42, 4 }
  0xd4   :  { %v109_v44 = vadd.f32 %v108_v43, %v107_v42 }
  0xd5   :  { %v130_v46 = vpop.xlane.xlu0 %129 }
  0xd6   :  { %v110_v47 = vrot.slane %v109_v44, 2  ;;  %v131_v48 = vrot.slane %v130_v46, 4 }
  0xd8   :  { %v132_v49 = vadd.f32 %v131_v48, %v130_v46  ;;  %v111_v50 = vadd.f32 %v110_v47, %v109_v44 }
  0xda   :  { %v133_v52 = vrot.slane %v132_v49, 2  ;;  %v112_v53 = vrot.slane %v111_v50, 1 }
  0xdc   :  { %v134_v54 = vadd.f32 %v133_v52, %v132_v49  ;;  %v113_v55 = vadd.f32 %v112_v53, %v111_v50 }
  0xde   :  { %190 = vpush %v113_v55  ;;  %v135_v57 = vrot.slane %v134_v54, 1 }
  0xe0   :  { %v136_v58 = vadd.f32 %v135_v57, %v134_v54 }
  0xe2   :  { %192 = vpush %v136_v58 }
  0xe3   :  { %194 = vpush %v148_v59 }
 0x10f   :  { %s191_s1 = spop %190 }
 0x110   :  { %116 = sst [smem:[#allocation8]] %s191_s1 }
 0x111   :  { %262 = shalt.err (!%p259_p4)
}
 0x112   :  { %s295_s7 = smov [#allocation8]   ;;  %s263_s14 = scalar_lea.hbm %s406_s5, 16 }
 0x113   :  { %159 = dma.smem_to_hbm %s295_s7, 16, %s405_s4, [#allocation5]  }
 0x114   :  { %s193_s10 = spop %192  ;;  %p264_p5 = scmp.ne.s32.totalorder %s406_s5, %s263_s14 }
 0x115   :  { %139 = sst [smem:[#allocation9]] %s193_s10  ;;  %s195_s11 = spop %194 }
 0x116   :  { %151 = sst [smem:[#allocation11]] %s195_s11  ;;  %p267_p6 = scmp.lt.u32.totalorder %s263_s14, %s406_s5 }
 0x118   :  { %p269_p7 = pnand %p267_p6, %p264_p5 }
 0x11a   :  { %272 = shalt.err (!%p269_p7)
}
 0x11b   :  { %s296_s19 = smov [#allocation9]   ;;  %s273_s22 = scalar_lea.hbm %s407_s6, 16 }
 0x11c   :  { %167 = dma.smem_to_hbm %s296_s19, 16, %s406_s5, [#allocation10]  }
 0x11d   :  { %p274_p8 = scmp.ne.s32.totalorder %s407_s6, %s273_s22  ;;  %p277_p9 = scmp.lt.u32.totalorder %s273_s22, %s407_s6 }
 0x11f   :  { %p279_p10 = pnand %p277_p9, %p274_p8 }
 0x121   :  { %282 = shalt.err (!%p279_p10)
}
 0x122   :  { %s297_s2 = smov [#allocation11]  }
 0x123   :  { %175 = dma.smem_to_hbm %s297_s2, 16, %s407_s6, [#allocation10]  }
 0x124   :  { %287 = dma.done.wait [#allocation5], 16  }
 0x125   :  { %288 = vsyncadd [#allocation5], 4294967280 }
 0x126   :  { %289 = dma.done.wait [#allocation10], 32  }
 0x127   :  { %290 = vsyncadd [#allocation10], 4294967264 }
 0x128   :  { %185 = sfence }
 0x129   :  { %186 = vsyncpa [#allocation4], 1 }
 0x12a   :  { %187 = vsyncpa [#allocation7], 1 }
 0x12b   :  { %188 = vsyncpa [#allocation5], 1 }
 0x12c   :  { %189 = vsyncpa [#allocation10], 1 }

</bundles_post_ra>
